<compile_context>
chip_gen: v7x
topology: tpu7x:2x2x1
jax: 0.10.0
libtpu: 0.0.40
codegen_flags: <defaults>
</compile_context>

<pallas_src>
import jax
import jax.numpy as jnp
from jax.experimental import pallas as pl
from jax.experimental.pallas import tpu as pltpu

HIDDEN_SIZE = 32


def _round_up(x, m):
    return ((x + m - 1) // m) * m


def _model_kernel(obs_ref, act_ref,
                  w1o_ref, w1a_ref, b1_ref,
                  w2_ref, b2_ref,
                  w3_ref, b3_ref,
                  o_ref):
    # Streamed tiles arrive as f32; cast to bf16 on the VPU for the MXU.
    obs = obs_ref[...].astype(jnp.bfloat16)        # (TB, obs_dim)
    act = act_ref[...].astype(jnp.bfloat16)        # (TB, act_dim)

    # fc1 on the (virtual) concatenation: cat(o, a) @ W1 == o @ W1o + a @ W1a
    h1 = (jnp.dot(obs, w1o_ref[...], preferred_element_type=jnp.float32)
          + jnp.dot(act, w1a_ref[...], preferred_element_type=jnp.float32)
          + b1_ref[...])
    h1 = jnp.tanh(h1)                              # f32 elementwise (EUP)

    # fc2 + ReLU
    h2 = jnp.dot(h1.astype(w2_ref.dtype), w2_ref[...],
                 preferred_element_type=jnp.float32) + b2_ref[...]
    h2 = jnp.maximum(h2, 0.0)

    # out layer at its real width (no 128-lane zero padding).
    y = jnp.dot(h2.astype(w3_ref.dtype), w3_ref[...],
                preferred_element_type=jnp.float32) + b3_ref[...]

    o_ref[...] = y.astype(o_ref.dtype)


def model_forward(observation, action, params, *, tile_b=1024):
    """observation: (B, obs_dim) f32, action: (B, action_dim) f32 -> (B, action_dim) f32."""
    B, obs_dim = observation.shape
    act_dim = action.shape[1]
    out_dim = params["w3"].shape[1]

    # Even batch split into 8-row-aligned tiles; force >=2 steps for large B
    # so the "parallel" grid axis can use both v7x TensorCores.
    n_steps = max(1, pl.cdiv(B, tile_b))
    if n_steps == 1 and B >= 256:
        n_steps = 2
    tb = _round_up(pl.cdiv(B, n_steps), 8)
    n_steps = pl.cdiv(B, tb)

    # Weights as bf16 MXU operands (tiny one-time cast); biases stay f32.
    w1o = params["w1o"].astype(jnp.bfloat16)
    w1a = params["w1a"].astype(jnp.bfloat16)
    w2 = params["w2"].astype(jnp.bfloat16)
    w3 = params["w3"].astype(jnp.bfloat16)
    b1 = params["b1"].astype(jnp.float32)
    b2 = params["b2"].astype(jnp.float32)
    b3 = params["b3"].astype(jnp.float32)

    def resident(arr):
        # Constant block index -> fetched once, stays VMEM-resident across steps.
        return pl.BlockSpec(arr.shape, lambda i: (0,) * arr.ndim)

    out = pl.pallas_call(
        _model_kernel,
        out_shape=jax.ShapeDtypeStruct((B, out_dim), jnp.float32),
        grid=(n_steps,),
        in_specs=[
            pl.BlockSpec((tb, obs_dim), lambda i: (i, 0)),
            pl.BlockSpec((tb, act_dim), lambda i: (i, 0)),
            resident(w1o), resident(w1a), resident(b1),
            resident(w2), resident(b2),
            resident(w3), resident(b3),
        ],
        out_specs=pl.BlockSpec((tb, out_dim), lambda i: (i, 0)),
        compiler_params=pltpu.CompilerParams(
            dimension_semantics=("parallel",)),
    )(observation, action, w1o, w1a, b1, w2, b2, w3, b3)

    return out


def init_model_params(key, obs_dim, action_dim):
    """nn.Linear-style uniform init. fc1's weight is stored split into the
    observation part (obs_dim, H) and the action part (action_dim, H); all
    weights are (in_features, out_features), i.e. transposed vs. PyTorch."""
    in_dim = obs_dim + action_dim
    ks = jax.random.split(key, 6)

    def linear(kw, kb, fan_in, fan_out):
        bound = 1.0 / (float(fan_in) ** 0.5)
        w = jax.random.uniform(kw, (fan_in, fan_out), jnp.float32, -bound, bound)
        b = jax.random.uniform(kb, (1, fan_out), jnp.float32, -bound, bound)
        return w, b

    w1, b1 = linear(ks[0], ks[1], in_dim, HIDDEN_SIZE)
    w2, b2 = linear(ks[2], ks[3], HIDDEN_SIZE, HIDDEN_SIZE)
    w3, b3 = linear(ks[4], ks[5], HIDDEN_SIZE, action_dim)
    return {"w1o": w1[:obs_dim], "w1a": w1[obs_dim:], "b1": b1,
            "w2": w2, "b2": b2, "w3": w3, "b3": b3}


def model_reference(observation, action, params):
    """Pure-JAX reference with the same bf16-operand / f32-accumulate numerics."""
    x = jnp.concatenate([observation, action], axis=-1).astype(jnp.bfloat16)
    w1 = jnp.concatenate([params["w1o"], params["w1a"]], axis=0).astype(jnp.bfloat16)
    h1 = jnp.tanh(jnp.dot(x, w1, preferred_element_type=jnp.float32) + params["b1"])
    h2 = jnp.maximum(
        jnp.dot(h1.astype(jnp.bfloat16), params["w2"].astype(jnp.bfloat16),
                preferred_element_type=jnp.float32) + params["b2"], 0.0)
    return (jnp.dot(h2.astype(jnp.bfloat16), params["w3"].astype(jnp.bfloat16),
                    preferred_element_type=jnp.float32) + params["b3"])


if __name__ == "__main__":
    key = jax.random.PRNGKey(0)
    k_param, k_obs, k_act, k_obs2, k_act2 = jax.random.split(key, 5)

    batch = 8
    obs_dim = 16
    action_dim = 4

    params = init_model_params(k_param, obs_dim, action_dim)

    # Small case (single grid step, exactly-divisible block).
    obs = jax.random.normal(k_obs, (batch, obs_dim), jnp.float32)
    act = jax.random.normal(k_act, (batch, action_dim), jnp.float32)
    out = jax.block_until_ready(model_forward(obs, act, params))
    ref = model_reference(obs, act, params)
    assert out.shape == (batch, action_dim)
    assert jnp.allclose(out, ref, atol=1e-3, rtol=1e-3), "small-batch mismatch"

    # Larger, non-aligned batch: multi-step grid with a ragged (masked) tail block.
    batch2 = 1030
    obs2 = jax.random.normal(k_obs2, (batch2, obs_dim), jnp.float32)
    act2 = jax.random.normal(k_act2, (batch2, action_dim), jnp.float32)
    out2 = jax.block_until_ready(model_forward(obs2, act2, params))
    ref2 = model_reference(obs2, act2, params)
    assert out2.shape == (batch2, action_dim)
    assert jnp.allclose(out2, ref2, atol=1e-3, rtol=1e-3), "tiled-batch mismatch"

    print("KERNEL_OK")
</pallas_src>

<mosaic_0001>
module attributes {stable_mosaic.version = 11 : i64} {
  func.func @_model_kernel(%arg0: i32, %arg1: memref<8x16xf32, #tpu.memory_space<vmem>>, %arg2: memref<8x4xf32, #tpu.memory_space<vmem>>, %arg3: memref<16x32xbf16, #tpu.memory_space<vmem>>, %arg4: memref<4x32xbf16, #tpu.memory_space<vmem>>, %arg5: memref<1x32xf32, #tpu.memory_space<vmem>>, %arg6: memref<32x32xbf16, #tpu.memory_space<vmem>>, %arg7: memref<1x32xf32, #tpu.memory_space<vmem>>, %arg8: memref<32x4xbf16, #tpu.memory_space<vmem>>, %arg9: memref<1x4xf32, #tpu.memory_space<vmem>>, %arg10: memref<8x4xf32, #tpu.memory_space<vmem>>) attributes {dimension_semantics = [#tpu.dimension_semantics<parallel>], iteration_bounds = array<i64: 1>, scalar_prefetch = 0 : i64, scratch_operands = 0 : i64, tpu.core_type = #tpu.core_type<tc>, window_params = [{transform_indices = @transform_0, window_bounds = array<i64: 8, 16>}, {transform_indices = @transform_1, window_bounds = array<i64: 8, 4>}, {pipeline_mode = #tpu.pipeline_mode<synchronous>, transform_indices = @transform_2, window_bounds = array<i64: 16, 32>}, {pipeline_mode = #tpu.pipeline_mode<synchronous>, transform_indices = @transform_3, window_bounds = array<i64: 4, 32>}, {pipeline_mode = #tpu.pipeline_mode<synchronous>, transform_indices = @transform_4, window_bounds = array<i64: 1, 32>}, {pipeline_mode = #tpu.pipeline_mode<synchronous>, transform_indices = @transform_5, window_bounds = array<i64: 32, 32>}, {pipeline_mode = #tpu.pipeline_mode<synchronous>, transform_indices = @transform_6, window_bounds = array<i64: 1, 32>}, {pipeline_mode = #tpu.pipeline_mode<synchronous>, transform_indices = @transform_7, window_bounds = array<i64: 32, 4>}, {pipeline_mode = #tpu.pipeline_mode<synchronous>, transform_indices = @transform_8, window_bounds = array<i64: 1, 4>}, {transform_indices = @transform_9, window_bounds = array<i64: 8, 4>}]} {
    %c0 = arith.constant 0 : index
    %c0_0 = arith.constant 0 : index
    %0 = vector.load %arg1[%c0, %c0_0] : memref<8x16xf32, #tpu.memory_space<vmem>>, vector<8x16xf32>
    %1 = arith.truncf %0 : vector<8x16xf32> to vector<8x16xbf16>
    %c0_1 = arith.constant 0 : index
    %c0_2 = arith.constant 0 : index
    %2 = vector.load %arg2[%c0_1, %c0_2] : memref<8x4xf32, #tpu.memory_space<vmem>>, vector<8x4xf32>
    %3 = arith.truncf %2 : vector<8x4xf32> to vector<8x4xbf16>
    %c0_3 = arith.constant 0 : index
    %c0_4 = arith.constant 0 : index
    %4 = vector.load %arg3[%c0_3, %c0_4] : memref<16x32xbf16, #tpu.memory_space<vmem>>, vector<16x32xbf16>
    %cst = arith.constant dense<0.000000e+00> : vector<8x32xf32>
    %5 = tpu.matmul %1, %4, %cst {dimension_numbers = #tpu.dot_dimension_numbers<[1], [0], [0], [1], [0, 0, 1, 1], [], []>} : vector<8x16xbf16>, vector<16x32xbf16>, vector<8x32xf32> -> vector<8x32xf32>
    %c0_5 = arith.constant 0 : index
    %c0_6 = arith.constant 0 : index
    %6 = vector.load %arg4[%c0_5, %c0_6] : memref<4x32xbf16, #tpu.memory_space<vmem>>, vector<4x32xbf16>
    %cst_7 = arith.constant dense<0.000000e+00> : vector<8x32xf32>
    %7 = tpu.matmul %3, %6, %cst_7 {dimension_numbers = #tpu.dot_dimension_numbers<[1], [0], [0], [1], [0, 0, 1, 1], [], []>} : vector<8x4xbf16>, vector<4x32xbf16>, vector<8x32xf32> -> vector<8x32xf32>
    %8 = arith.addf %5, %7 : vector<8x32xf32>
    %c0_8 = arith.constant 0 : index
    %c0_9 = arith.constant 0 : index
    %9 = vector.load %arg5[%c0_8, %c0_9] : memref<1x32xf32, #tpu.memory_space<vmem>>, vector<1x32xf32>
    %10 = vector.broadcast %9 : vector<1x32xf32> to vector<8x32xf32>
    %11 = arith.addf %8, %10 : vector<8x32xf32>
    %12 = math.tanh %11 : vector<8x32xf32>
    %13 = arith.truncf %12 : vector<8x32xf32> to vector<8x32xbf16>
    %c0_10 = arith.constant 0 : index
    %c0_11 = arith.constant 0 : index
    %14 = vector.load %arg6[%c0_10, %c0_11] : memref<32x32xbf16, #tpu.memory_space<vmem>>, vector<32x32xbf16>
    %cst_12 = arith.constant dense<0.000000e+00> : vector<8x32xf32>
    %15 = tpu.matmul %13, %14, %cst_12 {dimension_numbers = #tpu.dot_dimension_numbers<[1], [0], [0], [1], [0, 0, 1, 1], [], []>} : vector<8x32xbf16>, vector<32x32xbf16>, vector<8x32xf32> -> vector<8x32xf32>
    %c0_13 = arith.constant 0 : index
    %c0_14 = arith.constant 0 : index
    %16 = vector.load %arg7[%c0_13, %c0_14] : memref<1x32xf32, #tpu.memory_space<vmem>>, vector<1x32xf32>
    %17 = vector.broadcast %16 : vector<1x32xf32> to vector<8x32xf32>
    %18 = arith.addf %15, %17 : vector<8x32xf32>
    %cst_15 = arith.constant 0.000000e+00 : f32
    %19 = vector.broadcast %cst_15 : f32 to vector<8x32xf32>
    %20 = arith.maximumf %18, %19 : vector<8x32xf32>
    %21 = arith.truncf %20 : vector<8x32xf32> to vector<8x32xbf16>
    %c0_16 = arith.constant 0 : index
    %c0_17 = arith.constant 0 : index
    %22 = vector.load %arg8[%c0_16, %c0_17] : memref<32x4xbf16, #tpu.memory_space<vmem>>, vector<32x4xbf16>
    %cst_18 = arith.constant dense<0.000000e+00> : vector<8x4xf32>
    %23 = tpu.matmul %21, %22, %cst_18 {dimension_numbers = #tpu.dot_dimension_numbers<[1], [0], [0], [1], [0, 0, 1, 1], [], []>} : vector<8x32xbf16>, vector<32x4xbf16>, vector<8x4xf32> -> vector<8x4xf32>
    %c0_19 = arith.constant 0 : index
    %c0_20 = arith.constant 0 : index
    %24 = vector.load %arg9[%c0_19, %c0_20] : memref<1x4xf32, #tpu.memory_space<vmem>>, vector<1x4xf32>
    %25 = vector.broadcast %24 : vector<1x4xf32> to vector<8x4xf32>
    %26 = arith.addf %23, %25 : vector<8x4xf32>
    %c0_21 = arith.constant 0 : index
    %c0_22 = arith.constant 0 : index
    %27 = vector.load %arg10[%c0_21, %c0_22] : memref<8x4xf32, #tpu.memory_space<vmem>>, vector<8x4xf32>
    tpu.vector_store %arg10[%c0_21, %c0_22], %26 {strides = array<i32>} : memref<8x4xf32, #tpu.memory_space<vmem>>, vector<8x4xf32>,
    return
  }
  func.func @transform_0(%arg0: i32) -> (i32, i32) {
    %c0_i32 = arith.constant 0 : i32
    %c0_i32_0 = arith.constant 0 : i32
    return %arg0, %c0_i32 : i32, i32
  }
  func.func @transform_1(%arg0: i32) -> (i32, i32) {
    %c0_i32 = arith.constant 0 : i32
    %c0_i32_0 = arith.constant 0 : i32
    return %arg0, %c0_i32 : i32, i32
  }
  func.func @transform_2(%arg0: i32) -> (i32, i32) {
    %c0_i32 = arith.constant 0 : i32
    %c0_i32_0 = arith.constant 0 : i32
    %c0_i32_1 = arith.constant 0 : i32
    return %c0_i32, %c0_i32_0 : i32, i32
  }
  func.func @transform_3(%arg0: i32) -> (i32, i32) {
    %c0_i32 = arith.constant 0 : i32
    %c0_i32_0 = arith.constant 0 : i32
    %c0_i32_1 = arith.constant 0 : i32
    return %c0_i32, %c0_i32_0 : i32, i32
  }
  func.func @transform_4(%arg0: i32) -> (i32, i32) {
    %c0_i32 = arith.constant 0 : i32
    %c0_i32_0 = arith.constant 0 : i32
    %c0_i32_1 = arith.constant 0 : i32
    return %c0_i32, %c0_i32_0 : i32, i32
  }
  func.func @transform_5(%arg0: i32) -> (i32, i32) {
    %c0_i32 = arith.constant 0 : i32
    %c0_i32_0 = arith.constant 0 : i32
    %c0_i32_1 = arith.constant 0 : i32
    return %c0_i32, %c0_i32_0 : i32, i32
  }
  func.func @transform_6(%arg0: i32) -> (i32, i32) {
    %c0_i32 = arith.constant 0 : i32
    %c0_i32_0 = arith.constant 0 : i32
    %c0_i32_1 = arith.constant 0 : i32
    return %c0_i32, %c0_i32_0 : i32, i32
  }
  func.func @transform_7(%arg0: i32) -> (i32, i32) {
    %c0_i32 = arith.constant 0 : i32
    %c0_i32_0 = arith.constant 0 : i32
    %c0_i32_1 = arith.constant 0 : i32
    return %c0_i32, %c0_i32_0 : i32, i32
  }
  func.func @transform_8(%arg0: i32) -> (i32, i32) {
    %c0_i32 = arith.constant 0 : i32
    %c0_i32_0 = arith.constant 0 : i32
    %c0_i32_1 = arith.constant 0 : i32
    return %c0_i32, %c0_i32_0 : i32, i32
  }
  func.func @transform_9(%arg0: i32) -> (i32, i32) {
    %c0_i32 = arith.constant 0 : i32
    %c0_i32_0 = arith.constant 0 : i32
    return %arg0, %c0_i32 : i32, i32
  }
}

</mosaic_0001>

<bundles_post_ra>
// kernel: tpu_custom_call.1
= control target key start
LH: loop header
LB: loop body
LE: loop exit
PB: predicated region body
PF: predicated region fallthrough
CT: control target
= control target key end

     0   :  { %vm44_vm0 = vcmask 1041408   ;;  %v347_v0 = vmov 0.0   ;;  %vm348_vm1 = vmmov 0   ;;  %vm40_vm2 = vcmask 31744   ;;  %s441_s3 = inlined_call_operand.vmem [shape: bf16[4,32], index: 3, kind: input, shape index: {}]   ;;  %s442_s2 = inlined_call_operand.vmem [shape: bf16[16,32], index: 2, kind: input, shape index: {}]   ;;  %s443_s1 = inlined_call_operand.vmem [shape: f32[8,4], index: 1, kind: input, shape index: {}]   ;;  %s444_s0 = inlined_call_operand.vmem [shape: f32[8,16], index: 0, kind: input, shape index: {}]   ;;  %s445_s5 = inlined_call_operand.vmem [shape: bf16[32,32], index: 5, kind: input, shape index: {}]   ;;  %s446_s7 = inlined_call_operand.vmem [shape: bf16[32,4], index: 7, kind: input, shape index: {}]   ;;  %s447_s4 = inlined_call_operand.vmem [shape: f32[1,32], index: 4, kind: input, shape index: {}]   ;;  %s448_s6 = inlined_call_operand.vmem [shape: f32[1,32], index: 6, kind: input, shape index: {}]   ;;  %s449_s8 = inlined_call_operand.vmem [shape: f32[1,4], index: 8, kind: input, shape index: {}]   ;;  %s450_s9 = inlined_call_operand.vmem [shape: f32[8,4], index: 9, kind: output, shape index: {}]  }
   0x1   :  { %310 = vmatprep.subr.bf16.mxu0 %v347_v0  ;;  %v39_v1 = vld [vmem:[%s441_s3] sm:$0x3]  ;;  %316 = vmatprep.subr.bf16.mxu1 %v347_v0  ;;  %vm94_vm3 = vcmask 130048   ;;  %v342_v9 = vld [vmem:[%s445_s5 + $0x8] sm:$0xff]   ;;  %vm171_vm4 = vcmask 261120  }
   0x2   :  { %v46_v2 = vsel %vm44_vm0, %v39_v1, 0  ;;  %v340_v3 = vld [vmem:[%s442_s2] sm:$0xff]   ;;  %312 = vmatprep.mubr.msk.bf16.mxu0 %vm348_vm1, %v347_v0  ;;  %318 = vmatprep.mubr.msk.bf16.mxu1 %vm348_vm1, %v347_v0  ;;  %v344_v24 = vld [vmem:[%s446_s7 + $0x8] sm:$0xff]  }
   0x3   :  { %v35_v4 = vld [vmem:[%s443_s1] sm:$0xff]  ;;  %311 = vmatpush3.bf16.msra.mxu0 %v46_v2  ;;  %317 = vmatpush3.bf16.msra.mxu1 %v340_v3 }
   0x4   :  { %v33_v5 = vld [vmem:[%s444_s0] sm:$0xff]  ;;  %v36_v6 = vpack.c.bf16 %v35_v4, %v35_v4  ;;  %322 = vmatprep.subr.bf16.mxu0 %v347_v0  ;;  %330 = vmatprep.subr.bf16.mxu1 %v347_v0 }
   0x5   :  { %v34_v7 = vpack.c.bf16 %v33_v5, %v33_v5  ;;  %v341_v8 = vld [vmem:[%s445_s5] sm:$0xff]  }
   0x6   :  { %313 = vmatmul.mubr.msk.bf16.vlgmr.msra.gmra.mrb[0].mxu0 %vm40_vm2, %v36_v6  ;;  %v343_v10 = vld [vmem:[%s446_s7] sm:$0xff]  }
   0x7   :  { %319 = vmatmul.mubr.msk.bf16.vlgmr.msra.gmra.mrb[0].mxu1 %vm94_vm3, %v34_v7  ;;  %326 = vmatprep.mubr.msk.bf16.mxu0 %vm348_vm1, %v347_v0  ;;  %v291_v14 = vld [vmem:[%s447_s4] ss:$0 sm:$0xff] }
   0x8   :  { %334 = vmatprep.mubr.msk.bf16.mxu1 %vm348_vm1, %v347_v0  ;;  %323 = vmatpush3.bf16.msra.mxu0 %v341_v8  ;;  %v292_v25 = vld [vmem:[%s448_s6] ss:$0 sm:$0xff] }
   0x9   :  { %324 = vmatprep.subr.bf16.mxu0 %v347_v0  ;;  %331 = vmatpush3.bf16.msra.mxu1 %v343_v10  ;;  %v296_v33 = vld [vmem:[%s449_s8] ss:$0 sm:$0xff] }
   0xa   :  { %332 = vmatprep.subr.bf16.mxu1 %v347_v0 }
   0xc   :  { %325 = vmatpush3.bf16.msra.mxu0 %v342_v9 }
   0xd   :  { %333 = vmatpush3.bf16.msra.mxu1 %v344_v24 }
  0xd9   :  { %v82_v11 = vpop.f32.mrb[0].mxu0 }
  0xda   :  { %v314_v12 = vpop.f32.mrb[1].mxu0  ;;  %v132_v13 = vpop.f32.mrb[0].mxu1 }
  0xdb   :  { %v133_v15 = vadd.f32 %v132_v13, %v82_v11  ;;  %v85_v16 = vpop.f32.mrb[2].mxu0  ;;  %v320_v17 = vpop.f32.mrb[1].mxu1 }
  0xdc   :  { %v315_v18 = vpop.f32.mrb[3].mxu0  ;;  %v135_v19 = vpop.f32.mrb[2].mxu1 }
  0xdd   :  { %v145_v20 = vadd.f32 %v291_v14, %v133_v15  ;;  %v321_v21 = vpop.f32.mrb[3].mxu1 }
  0xdf   :  { %345 = vtanh.f32 %v145_v20 }
  0xe9   :  { %v346_v22 = vpop.eup %345 }
  0xea   :  { %v147_v23 = vpack.c.bf16 %v346_v22, %v346_v22 }
  0xec   :  { %327 = vmatmul.mubr.msk.bf16.vlgmr.msra.gmra.mrb[4].mxu0 %vm171_vm4, %v147_v23 }
 0x1bf   :  { %v209_v26 = vpop.f32.mrb[4].mxu0 }
 0x1c0   :  { %v210_v27 = vadd.f32 %v292_v25, %v209_v26  ;;  %v328_v28 = vpop.f32.mrb[5].mxu0 }
 0x1c1   :  { %v212_v29 = vpop.f32.mrb[6].mxu0 }
 0x1c2   :  { %v215_v30 = vmax.f32 %v210_v27, 0.0  ;;  %v329_v31 = vpop.f32.mrb[7].mxu0 }
 0x1c4   :  { %v216_v32 = vpack.c.bf16 %v215_v30, %v215_v30 }
 0x1c6   :  { %335 = vmatmul.mubr.msk.bf16.vlgmr.msra.gmra.mrb[4].mxu1 %vm171_vm4, %v216_v32 }
 0x299   :  { %v277_v34 = vpop.f32.mrb[4].mxu1 }
 0x29a   :  { %v278_v35 = vadd.f32 %v296_v33, %v277_v34  ;;  %v336_v36 = vpop.f32.mrb[5].mxu1 }
 0x29b   :  { %v280_v37 = vpop.f32.mrb[6].mxu1 }
 0x29c   :  { %283 = vst.msk [vmem:[%s450_s9] sm:$0xff] %vm40_vm2, %v278_v35  ;;  %v337_v38 = vpop.f32.mrb[7].mxu1 }

</bundles_post_ra>
